<compile_context>
chip_gen: v7x
topology: tpu7x:2x2x1
jax: 0.10.0
libtpu: 0.0.40
codegen_flags: <defaults>
</compile_context>

<pallas_src>
import functools

import jax
import jax.numpy as jnp
from jax.experimental import pallas as pl
from jax.experimental.pallas import tpu as pltpu

LANE = 128


def _round_up(v, m):
    return ((v + m - 1) // m) * m


# --------------------------------------------------------------------------- kernel


def _classifier_kernel(x_ref,
                       w1_ref, b1_ref,
                       w2_ref, b2_ref,
                       w3_ref, b3_ref,
                       w4_ref, b4_ref,
                       o_ref):
    # Dropout layers are identity in eval mode. BN already folded into W/b in glue.
    # x arrives as f32 (no host pad/cast pass); cast to bf16 here for the MXU.
    x = x_ref[...].astype(jnp.bfloat16)

    h = jnp.dot(x, w1_ref[...], preferred_element_type=jnp.float32) + b1_ref[...]
    h = jnp.maximum(h, 0.0).astype(jnp.bfloat16)

    h = jnp.dot(h, w2_ref[...], preferred_element_type=jnp.float32) + b2_ref[...]
    h = jnp.maximum(h, 0.0).astype(jnp.bfloat16)

    h = jnp.dot(h, w3_ref[...], preferred_element_type=jnp.float32) + b3_ref[...]
    h = jnp.maximum(h, 0.0).astype(jnp.bfloat16)

    # Final layer keeps exactly num_label output lanes -> tiny logits / output stream.
    logits = jnp.dot(h, w4_ref[...], preferred_element_type=jnp.float32) + b4_ref[...]
    # Exact sigmoid: exp + divide sit on the EUP slot; only num_label lanes wide.
    o_ref[...] = (1.0 / (1.0 + jnp.exp(-logits))).astype(o_ref.dtype)


# --------------------------------------------------------------------------- wrapper


@functools.partial(jax.jit, static_argnames=("num_label", "tile_b"))
def classifier_forward(x, kparams, *, num_label, tile_b=2048):
    """x: (B, feature_dim) f32.  kparams: BN-folded, lane-padded bf16 weights / f32 biases."""
    B, F = x.shape
    p_out = kparams["w4"].shape[1]          # == num_label (unpadded output lanes)

    # Batch tile: biggest multiple of 8 up to tile_b ...
    tb = min(tile_b, _round_up(B, 8))
    # ... but make sure the grid has >= 2 steps so both v7x TensorCores get work.
    if B > 8 and pl.cdiv(B, tb) < 2:
        tb = _round_up(pl.cdiv(B, 2), 8)
    grid = pl.cdiv(B, tb)                   # short final tile, no padding to tile multiples

    weights = (kparams["w1"], kparams["b1"],
               kparams["w2"], kparams["b2"],
               kparams["w3"], kparams["b3"],
               kparams["w4"], kparams["b4"])

    def resident(shape):
        # Grid-invariant block index -> stays resident in VMEM across batch tiles.
        # (~0.1 MB of weights; default double-buffering overhead is negligible here.)
        return pl.BlockSpec(shape, lambda i: (0, 0))

    out = pl.pallas_call(
        _classifier_kernel,
        out_shape=jax.ShapeDtypeStruct((B, p_out), jnp.float32),
        grid=(grid,),
        in_specs=[pl.BlockSpec((tb, F), lambda i: (i, 0))]     # x: f32, K = feature_dim (no pad)
                 + [resident(w.shape) for w in weights],
        out_specs=pl.BlockSpec((tb, p_out), lambda i: (i, 0)),  # (tb, num_label): real lanes only
        compiler_params=pltpu.CompilerParams(
            dimension_semantics=("parallel",),
            vmem_limit_bytes=48 * 1024 * 1024,
        ),
    )(x, *weights)

    return out


# --------------------------------------------------------------------------- params


def init_raw_params(key, feature_dim, num_label):
    """Deterministic synthetic parameters (PyTorch-style uniform Linear init + BN stats)."""
    dims = [feature_dim, feature_dim // 2, feature_dim // 2, feature_dim // 8, num_label]
    raw = {}
    keys = jax.random.split(key, 20)
    ki = 0
    for li in range(4):
        fan_in, fan_out = dims[li], dims[li + 1]
        bound = 1.0 / float(fan_in) ** 0.5
        raw[f"w{li + 1}"] = jax.random.uniform(
            keys[ki], (fan_in, fan_out), jnp.float32, minval=-bound, maxval=bound)
        ki += 1
        raw[f"b{li + 1}"] = jax.random.uniform(
            keys[ki], (fan_out,), jnp.float32, minval=-bound, maxval=bound)
        ki += 1
        if li < 3:  # BatchNorm1d follows the first three Linear layers
            raw[f"gamma{li + 1}"] = 1.0 + 0.1 * jax.random.normal(keys[ki], (fan_out,), jnp.float32)
            ki += 1
            raw[f"beta{li + 1}"] = 0.1 * jax.random.normal(keys[ki], (fan_out,), jnp.float32)
            ki += 1
            raw[f"mean{li + 1}"] = 0.05 * jnp.arange(fan_out, dtype=jnp.float32)
            raw[f"var{li + 1}"] = 1.0 + 0.01 * jnp.arange(fan_out, dtype=jnp.float32)
    return raw, dims


def fold_and_pad_params(raw, dims, eps=1e-5):
    """Fold eval-mode BN into Linear; pad hidden dims to 128 lanes; keep the input dim
    (= feature_dim, matches x) and the final output dim (= num_label) unpadded."""
    kp = {}
    n_layers = 4
    for li in range(n_layers):
        fan_in, fan_out = dims[li], dims[li + 1]
        w = raw[f"w{li + 1}"]
        b = raw[f"b{li + 1}"]
        if li < 3:
            scale = raw[f"gamma{li + 1}"] / jnp.sqrt(raw[f"var{li + 1}"] + eps)
            shift = raw[f"beta{li + 1}"] - raw[f"mean{li + 1}"] * scale
            w = w * scale[None, :]
            b = b * scale + shift
        p_in = fan_in if li == 0 else _round_up(fan_in, LANE)
        p_out = fan_out if li == n_layers - 1 else _round_up(fan_out, LANE)
        w_p = jnp.zeros((p_in, p_out), jnp.float32).at[:fan_in, :fan_out].set(w)
        b_p = jnp.zeros((1, p_out), jnp.float32).at[0, :fan_out].set(b)
        kp[f"w{li + 1}"] = w_p.astype(jnp.bfloat16)  # MXU input dtype
        kp[f"b{li + 1}"] = b_p                       # biases stay f32 (exact epilogue)
    return kp


# --------------------------------------------------------------------------- references


def reference_quantized(x, kparams, num_label):
    """Pure-JAX mirror of the kernel's numerics (bf16 weights/activations, f32 accum)."""
    h = x.astype(jnp.bfloat16).astype(jnp.float32)
    for li in range(1, 4):
        h = h @ kparams[f"w{li}"].astype(jnp.float32) + kparams[f"b{li}"]
        h = jnp.maximum(h, 0.0).astype(jnp.bfloat16).astype(jnp.float32)
    logits = h @ kparams["w4"].astype(jnp.float32) + kparams["b4"]
    return jax.nn.sigmoid(logits)[:, :num_label]


def reference_full_precision(x, raw, eps=1e-5):
    """Full-precision reference of the original module's eval-mode forward."""
    h = x.astype(jnp.float32)
    for li in range(1, 4):
        h = h @ raw[f"w{li}"] + raw[f"b{li}"]
        scale = raw[f"gamma{li}"] / jnp.sqrt(raw[f"var{li}"] + eps)
        shift = raw[f"beta{li}"] - raw[f"mean{li}"] * scale
        h = jnp.maximum(h * scale + shift, 0.0)
    logits = h @ raw["w4"] + raw["b4"]
    return jax.nn.sigmoid(logits)


# --------------------------------------------------------------------------- main


if __name__ == "__main__":
    feature_dim = 64   # -> hidden dims 32, 32, 8 (padded to 128 lanes internally)
    num_label = 4
    batch = 16

    key = jax.random.PRNGKey(0)
    k_x, k_p = jax.random.split(key)
    x = jax.random.normal(k_x, (batch, feature_dim), dtype=jnp.float32)

    raw, dims = init_raw_params(k_p, feature_dim, num_label)
    kparams = fold_and_pad_params(raw, dims)
    assert kparams["w4"].shape[1] == num_label

    out = classifier_forward(x, kparams, num_label=num_label)
    out = jax.block_until_ready(out)

    ref_q = reference_quantized(x, kparams, num_label)
    ref_f = reference_full_precision(x, raw)

    assert out.shape == (batch, num_label), out.shape
    assert bool(jnp.all(jnp.isfinite(out)))
    # Kernel vs. exact bf16-quantized mirror (differences: MXU accumulation order only).
    assert jnp.allclose(out, ref_q, atol=5e-3), float(jnp.max(jnp.abs(out - ref_q)))
    # Kernel vs. full-precision module semantics (bf16 weight/activation quantization drift).
    assert jnp.allclose(out, ref_f, atol=3e-2), float(jnp.max(jnp.abs(out - ref_f)))

    print("KERNEL_OK")
</pallas_src>

<mosaic_0001>
module attributes {stable_mosaic.version = 11 : i64} {
  func.func @_classifier_kernel(%arg0: i32, %arg1: memref<8x64xf32, #tpu.memory_space<vmem>>, %arg2: memref<64x128xbf16, #tpu.memory_space<vmem>>, %arg3: memref<1x128xf32, #tpu.memory_space<vmem>>, %arg4: memref<128x128xbf16, #tpu.memory_space<vmem>>, %arg5: memref<1x128xf32, #tpu.memory_space<vmem>>, %arg6: memref<128x128xbf16, #tpu.memory_space<vmem>>, %arg7: memref<1x128xf32, #tpu.memory_space<vmem>>, %arg8: memref<128x4xbf16, #tpu.memory_space<vmem>>, %arg9: memref<1x4xf32, #tpu.memory_space<vmem>>, %arg10: memref<8x4xf32, #tpu.memory_space<vmem>>) attributes {dimension_semantics = [#tpu.dimension_semantics<parallel>], iteration_bounds = array<i64: 2>, scalar_prefetch = 0 : i64, scratch_operands = 0 : i64, tpu.core_type = #tpu.core_type<tc>, window_params = [{transform_indices = @transform_0, window_bounds = array<i64: 8, 64>}, {pipeline_mode = #tpu.pipeline_mode<synchronous>, transform_indices = @transform_1, window_bounds = array<i64: 64, 128>}, {pipeline_mode = #tpu.pipeline_mode<synchronous>, transform_indices = @transform_2, window_bounds = array<i64: 1, 128>}, {pipeline_mode = #tpu.pipeline_mode<synchronous>, transform_indices = @transform_3, window_bounds = array<i64: 128, 128>}, {pipeline_mode = #tpu.pipeline_mode<synchronous>, transform_indices = @transform_4, window_bounds = array<i64: 1, 128>}, {pipeline_mode = #tpu.pipeline_mode<synchronous>, transform_indices = @transform_5, window_bounds = array<i64: 128, 128>}, {pipeline_mode = #tpu.pipeline_mode<synchronous>, transform_indices = @transform_6, window_bounds = array<i64: 1, 128>}, {pipeline_mode = #tpu.pipeline_mode<synchronous>, transform_indices = @transform_7, window_bounds = array<i64: 128, 4>}, {pipeline_mode = #tpu.pipeline_mode<synchronous>, transform_indices = @transform_8, window_bounds = array<i64: 1, 4>}, {transform_indices = @transform_9, window_bounds = array<i64: 8, 4>}]} {
    %c0 = arith.constant 0 : index
    %c0_0 = arith.constant 0 : index
    %0 = vector.load %arg1[%c0, %c0_0] : memref<8x64xf32, #tpu.memory_space<vmem>>, vector<8x64xf32>
    %1 = arith.truncf %0 : vector<8x64xf32> to vector<8x64xbf16>
    %c0_1 = arith.constant 0 : index
    %c0_2 = arith.constant 0 : index
    %2 = vector.load %arg2[%c0_1, %c0_2] : memref<64x128xbf16, #tpu.memory_space<vmem>>, vector<64x128xbf16>
    %cst = arith.constant dense<0.000000e+00> : vector<8x128xf32>
    %3 = tpu.matmul %1, %2, %cst {dimension_numbers = #tpu.dot_dimension_numbers<[1], [0], [0], [1], [0, 0, 1, 1], [], []>} : vector<8x64xbf16>, vector<64x128xbf16>, vector<8x128xf32> -> vector<8x128xf32>
    %c0_3 = arith.constant 0 : index
    %c0_4 = arith.constant 0 : index
    %4 = vector.load %arg3[%c0_3, %c0_4] : memref<1x128xf32, #tpu.memory_space<vmem>>, vector<1x128xf32>
    %5 = vector.broadcast %4 : vector<1x128xf32> to vector<8x128xf32>
    %6 = arith.addf %3, %5 : vector<8x128xf32>
    %cst_5 = arith.constant 0.000000e+00 : f32
    %7 = vector.broadcast %cst_5 : f32 to vector<8x128xf32>
    %8 = arith.maximumf %6, %7 : vector<8x128xf32>
    %9 = arith.truncf %8 : vector<8x128xf32> to vector<8x128xbf16>
    %c0_6 = arith.constant 0 : index
    %c0_7 = arith.constant 0 : index
    %10 = vector.load %arg4[%c0_6, %c0_7] : memref<128x128xbf16, #tpu.memory_space<vmem>>, vector<128x128xbf16>
    %cst_8 = arith.constant dense<0.000000e+00> : vector<8x128xf32>
    %11 = tpu.matmul %9, %10, %cst_8 {dimension_numbers = #tpu.dot_dimension_numbers<[1], [0], [0], [1], [0, 0, 1, 1], [], []>} : vector<8x128xbf16>, vector<128x128xbf16>, vector<8x128xf32> -> vector<8x128xf32>
    %c0_9 = arith.constant 0 : index
    %c0_10 = arith.constant 0 : index
    %12 = vector.load %arg5[%c0_9, %c0_10] : memref<1x128xf32, #tpu.memory_space<vmem>>, vector<1x128xf32>
    %13 = vector.broadcast %12 : vector<1x128xf32> to vector<8x128xf32>
    %14 = arith.addf %11, %13 : vector<8x128xf32>
    %cst_11 = arith.constant 0.000000e+00 : f32
    %15 = vector.broadcast %cst_11 : f32 to vector<8x128xf32>
    %16 = arith.maximumf %14, %15 : vector<8x128xf32>
    %17 = arith.truncf %16 : vector<8x128xf32> to vector<8x128xbf16>
    %c0_12 = arith.constant 0 : index
    %c0_13 = arith.constant 0 : index
    %18 = vector.load %arg6[%c0_12, %c0_13] : memref<128x128xbf16, #tpu.memory_space<vmem>>, vector<128x128xbf16>
    %cst_14 = arith.constant dense<0.000000e+00> : vector<8x128xf32>
    %19 = tpu.matmul %17, %18, %cst_14 {dimension_numbers = #tpu.dot_dimension_numbers<[1], [0], [0], [1], [0, 0, 1, 1], [], []>} : vector<8x128xbf16>, vector<128x128xbf16>, vector<8x128xf32> -> vector<8x128xf32>
    %c0_15 = arith.constant 0 : index
    %c0_16 = arith.constant 0 : index
    %20 = vector.load %arg7[%c0_15, %c0_16] : memref<1x128xf32, #tpu.memory_space<vmem>>, vector<1x128xf32>
    %21 = vector.broadcast %20 : vector<1x128xf32> to vector<8x128xf32>
    %22 = arith.addf %19, %21 : vector<8x128xf32>
    %cst_17 = arith.constant 0.000000e+00 : f32
    %23 = vector.broadcast %cst_17 : f32 to vector<8x128xf32>
    %24 = arith.maximumf %22, %23 : vector<8x128xf32>
    %25 = arith.truncf %24 : vector<8x128xf32> to vector<8x128xbf16>
    %c0_18 = arith.constant 0 : index
    %c0_19 = arith.constant 0 : index
    %26 = vector.load %arg8[%c0_18, %c0_19] : memref<128x4xbf16, #tpu.memory_space<vmem>>, vector<128x4xbf16>
    %cst_20 = arith.constant dense<0.000000e+00> : vector<8x4xf32>
    %27 = tpu.matmul %25, %26, %cst_20 {dimension_numbers = #tpu.dot_dimension_numbers<[1], [0], [0], [1], [0, 0, 1, 1], [], []>} : vector<8x128xbf16>, vector<128x4xbf16>, vector<8x4xf32> -> vector<8x4xf32>
    %c0_21 = arith.constant 0 : index
    %c0_22 = arith.constant 0 : index
    %28 = vector.load %arg9[%c0_21, %c0_22] : memref<1x4xf32, #tpu.memory_space<vmem>>, vector<1x4xf32>
    %29 = vector.broadcast %28 : vector<1x4xf32> to vector<8x4xf32>
    %30 = arith.addf %27, %29 : vector<8x4xf32>
    %cst_23 = arith.constant 0.000000e+00 : f32
    %31 = vector.broadcast %cst_23 : f32 to vector<8x4xf32>
    %32 = arith.subf %31, %30 : vector<8x4xf32>
    %33 = math.exp %32 : vector<8x4xf32>
    %cst_24 = arith.constant 1.000000e+00 : f32
    %34 = vector.broadcast %cst_24 : f32 to vector<8x4xf32>
    %35 = arith.addf %34, %33 : vector<8x4xf32>
    %cst_25 = arith.constant 1.000000e+00 : f32
    %36 = vector.broadcast %cst_25 : f32 to vector<8x4xf32>
    %37 = arith.divf %36, %35 : vector<8x4xf32>
    %c0_26 = arith.constant 0 : index
    %c0_27 = arith.constant 0 : index
    %38 = vector.load %arg10[%c0_26, %c0_27] : memref<8x4xf32, #tpu.memory_space<vmem>>, vector<8x4xf32>
    tpu.vector_store %arg10[%c0_26, %c0_27], %37 {strides = array<i32>} : memref<8x4xf32, #tpu.memory_space<vmem>>, vector<8x4xf32>,
    return
  }
  func.func @transform_0(%arg0: i32) -> (i32, i32) {
    %c0_i32 = arith.constant 0 : i32
    %c0_i32_0 = arith.constant 0 : i32
    return %arg0, %c0_i32 : i32, i32
  }
  func.func @transform_1(%arg0: i32) -> (i32, i32) {
    %c0_i32 = arith.constant 0 : i32
    %c0_i32_0 = arith.constant 0 : i32
    %c0_i32_1 = arith.constant 0 : i32
    return %c0_i32, %c0_i32_0 : i32, i32
  }
  func.func @transform_2(%arg0: i32) -> (i32, i32) {
    %c0_i32 = arith.constant 0 : i32
    %c0_i32_0 = arith.constant 0 : i32
    %c0_i32_1 = arith.constant 0 : i32
    return %c0_i32, %c0_i32_0 : i32, i32
  }
  func.func @transform_3(%arg0: i32) -> (i32, i32) {
    %c0_i32 = arith.constant 0 : i32
    %c0_i32_0 = arith.constant 0 : i32
    %c0_i32_1 = arith.constant 0 : i32
    return %c0_i32, %c0_i32_0 : i32, i32
  }
  func.func @transform_4(%arg0: i32) -> (i32, i32) {
    %c0_i32 = arith.constant 0 : i32
    %c0_i32_0 = arith.constant 0 : i32
    %c0_i32_1 = arith.constant 0 : i32
    return %c0_i32, %c0_i32_0 : i32, i32
  }
  func.func @transform_5(%arg0: i32) -> (i32, i32) {
    %c0_i32 = arith.constant 0 : i32
    %c0_i32_0 = arith.constant 0 : i32
    %c0_i32_1 = arith.constant 0 : i32
    return %c0_i32, %c0_i32_0 : i32, i32
  }
  func.func @transform_6(%arg0: i32) -> (i32, i32) {
    %c0_i32 = arith.constant 0 : i32
    %c0_i32_0 = arith.constant 0 : i32
    %c0_i32_1 = arith.constant 0 : i32
    return %c0_i32, %c0_i32_0 : i32, i32
  }
  func.func @transform_7(%arg0: i32) -> (i32, i32) {
    %c0_i32 = arith.constant 0 : i32
    %c0_i32_0 = arith.constant 0 : i32
    %c0_i32_1 = arith.constant 0 : i32
    return %c0_i32, %c0_i32_0 : i32, i32
  }
  func.func @transform_8(%arg0: i32) -> (i32, i32) {
    %c0_i32 = arith.constant 0 : i32
    %c0_i32_0 = arith.constant 0 : i32
    %c0_i32_1 = arith.constant 0 : i32
    return %c0_i32, %c0_i32_0 : i32, i32
  }
  func.func @transform_9(%arg0: i32) -> (i32, i32) {
    %c0_i32 = arith.constant 0 : i32
    %c0_i32_0 = arith.constant 0 : i32
    return %arg0, %c0_i32 : i32, i32
  }
}

</mosaic_0001>

<bundles_post_ra>
// kernel: classifier_forward.1
= control target key start
LH: loop header
LB: loop body
LE: loop exit
PB: predicated region body
PF: predicated region fallthrough
CT: control target
= control target key end

     0   :  { %14 = vsyncpa [#allocation3], 0  ;;  %s1405_s0 = inlined_call_operand.vmem [shape: f32[16,64], index: 0, kind: input, shape index: {}]   ;;  %s1406_s1 = inlined_call_operand.hbm [shape: bf16[64,128], index: 1, kind: input, shape index: {}]   ;;  %s1407_s2 = inlined_call_operand.vmem [shape: f32[1,128], index: 2, kind: input, shape index: {}]   ;;  %s1408_s3 = inlined_call_operand.vmem [shape: bf16[128,128], index: 3, kind: input, shape index: {}]   ;;  %s1409_s4 = inlined_call_operand.vmem [shape: f32[1,128], index: 4, kind: input, shape index: {}]   ;;  %s1410_s5 = inlined_call_operand.hbm [shape: bf16[128,128], index: 5, kind: input, shape index: {}]   ;;  %s1411_s6 = inlined_call_operand.vmem [shape: f32[1,128], index: 6, kind: input, shape index: {}]   ;;  %s1412_s7 = inlined_call_operand.vmem [shape: bf16[128,4], index: 7, kind: input, shape index: {}]   ;;  %s1413_s8 = inlined_call_operand.vmem [shape: f32[1,4], index: 8, kind: input, shape index: {}]   ;;  %s1414_s9 = inlined_call_operand.vmem [shape: f32[16,4], index: 9, kind: output, shape index: {}]  }
   0x1   :  { %15 = vsyncpa [#allocation5], 0  ;;  %s1209_s30 = smov 0  }
   0x2 LB: > { %s1215_s10 = sadd.s32 4294967295, %s1151_s30   ;;  %p868_p0 = scmp.ge.s32.totalorder %s1151_s30, 1  ;;  %s1151_s30 = sphi %s1209_s30, %s21_s30  }
   0x3   : > { %p246_p1 = scmp.lt.s32.totalorder %s1151_s30, 3  ;;  %s1153_s11 = smov [#allocation2]  }
   0x4   : > { %s258_s12 = sshll.u32 %s1153_s11, 4  ;;  %p1415_p3 = scmp.eq.s32.totalorder %s1215_s10, 0  ;;  %s259_s12 = int_to_ptr.vmem [resolvable:$true] %s258_s12 }
   0x5   : > { %p1219_p2 = pnand %p868_p0, %p246_p1  ;;  %s1154_s14 = smov [#allocation4]  }
   0x6   : > { %s280_s15 = sshll.u32 %s1154_s14, 4  ;;  %s1081_s19 = scalar_lea.hbm %s1406_s1, 512  ;;  %s1232_s15 = int_to_ptr.vmem [resolvable:$true] %s280_s15 }
   0x7   : > { %s1417_s13 = scalar_select %p1219_p2, 1, 0 }
   0x8   : > { %p1024_p4 = pneg %p1219_p2  ;;  %p1082_p6 = scmp.ne.s32.totalorder %s1406_s1, %s1081_s19 }
   0x9   : > { %p1088_p10 = scmp.lt.u32.totalorder %s1081_s19, %s1406_s1 }
   0xa   : > { %p1228_p5 = pnand %p1415_p3, %p1024_p4 }
   0xc   : > { %p1083_p7 = pneg %p1228_p5 }
   0xe   : > { %p1084_p8 = pnand %p1083_p7, %p1082_p6 }
  0x10   : > { %p1085_p9 = pneg %p1084_p8 }
  0x12   : > { %p1090_p11 = pnand %p1088_p10, %p1085_p9 }
  0x14   : > { %1093 = shalt.err (!%p1090_p11)
}
  0x15   : > { %s1094_s24 = scalar_lea.vmem %s259_s12, 512  ;;  %p1102_p1 = scmp.lt.s32.totalorder %s259_s12, %s259_s12 }
  0x16   : > { %p1095_p12 = scmp.ne.s32.totalorder %s259_s12, %s1094_s24  ;;  %p1103_p4 = scmp.lt.s32.totalorder %s1094_s24, %s1094_s24 }
  0x18   : > { %p1097_p13 = pnand %p1095_p12, %p1083_p7  ;;  %p1104_p3 = por %p1103_p4, %p1102_p1 }
  0x1a   : > { %p1098_p0 = pneg %p1097_p13 }
  0x1c   : > { %p1105_p2 = pnand %p1104_p3, %p1098_p0 }
  0x1e   : > { %1108 = shalt.err (!%p1105_p2)
}
  0x1f   : > { %s1155_s25 = smov 64   ;;  %s1156_s26 = smov 4  }
  0x20   : > { %1027 = dma.hbm_to_vmem [thread:$0]  (!%p1228_p5), %s1406_s1, 512, %s259_s12, [#allocation3], %s1155_s25, %s1155_s25, %s1156_s26  }
  0x21   : > { %s1109_s14 = scalar_lea.hbm %s1410_s5, 1024 }
  0x22   : > { %p1110_p6 = scmp.ne.s32.totalorder %s1410_s5, %s1109_s14  ;;  %p1116_p8 = scmp.lt.u32.totalorder %s1109_s14, %s1410_s5 }
  0x24   : > { %p1112_p2 = pnand %p1110_p6, %p1083_p7 }
  0x26   : > { %p1113_p3 = pneg %p1112_p2 }
  0x28   : > { %p1118_p9 = pnand %p1116_p8, %p1113_p3 }
  0x2a   : > { %1121 = shalt.err (!%p1118_p9)
}
  0x2b   : > { %s1122_s12 = scalar_lea.vmem %s1232_s15, 1024  ;;  %p1130_p13 = scmp.lt.s32.totalorder %s1232_s15, %s1232_s15 }
  0x2c   : > { %p1123_p10 = scmp.ne.s32.totalorder %s1232_s15, %s1122_s12  ;;  %p1131_p0 = scmp.lt.s32.totalorder %s1122_s12, %s1122_s12 }
  0x2e   : > { %p1125_p11 = pnand %p1123_p10, %p1083_p7  ;;  %p1132_p1 = por %p1131_p0, %p1130_p13 }
  0x30   : > { %p1126_p12 = pneg %p1125_p11 }
  0x32   : > { %p1133_p4 = pnand %p1132_p1, %p1126_p12 }
  0x34   : > { %1136 = shalt.err (!%p1133_p4)
}
  0x35   : > { %1030 = dma.hbm_to_vmem [thread:$0]  (!%p1228_p5), %s1410_s5, 1024, %s1232_s15, [#allocation5], %s1155_s25, %s1155_s25, %s1156_s26  }
  0x36   : > { %p1419_p6 = scmp.ne.s32.totalorder %s1417_s13, 0 }
  0x37   : > { %p1420_p2 = scmp.eq.s32.totalorder (!%p1419_p6), %s1215_s10, 0 }
  0x38   : > { %312 = sbr.rel (%p1419_p6) target bundleno = 982 (0x3d6), region = 56 }
  0x3f   : > { %1142 = dma.done.wait (%p1420_p2), [#allocation3], 512   ;;  %p1421_p7 = pmov %p1420_p2 }
  0x40   : > { %p1422_p3 = pmov %p1420_p2 }
  0x41   : > { %1144 = vsyncadd (%p1421_p7), [#allocation3], 4294966784 }
  0x42   : > { %1146 = dma.done.wait (%p1422_p3), [#allocation5], 1024   ;;  %p1423_p8 = pmov %p1420_p2 }
  0x43   : > { %v1157_v0 = vmov 0.0   ;;  %vm1158_vm0 = vmmov 0   ;;  %p350_p5 = scmp.lt.s32.totalorder %s1215_s10, 1  ;;  %v1049_v1 = vld [vmem:[#allocation2] sm:$0xff]   ;;  %v1050_v2 = vld [vmem:[#allocation2 + $0x8] sm:$0xff]   ;;  %v1051_v4 = vld [vmem:[#allocation2 + $0x10] sm:$0xff]  }
  0x44   : > { %1148 = vsyncadd (%p1423_p8), [#allocation5], 4294966272  ;;  %944 = vmatprep.subr.bf16.mxu0 %v1157_v0  ;;  %952 = vmatprep.mubr.msk.bf16.mxu0 %vm1158_vm0, %v1157_v0  ;;  %v1053_v3 = vld [vmem:[%s1408_s3] sm:$0xff]   ;;  %v1054_v5 = vld [vmem:[%s1408_s3 + $0x8] sm:$0xff]   ;;  %vm400_vm1 = vcmask 523264   ;;  %vm789_vm2 = vcmask 31744  }
  0x45   : > { %956 = vmatprep.subr.bf16.mxu1 %v1157_v0  ;;  %972 = vmatprep.mubr.msk.bf16.mxu1 %vm1158_vm0, %v1157_v0  ;;  %s1425_s10 = smov (!%p350_p5, %s1215_s10), 1  ;;  %v1052_v6 = vld [vmem:[#allocation2 + $0x18] sm:$0xff]   ;;  %v1055_v8 = vld [vmem:[%s1408_s3 + $0x10] sm:$0xff]   ;;  %v1057_v11 = vld [vmem:[%s1408_s3 + $0x20] sm:$0xff]  }
  0x46   : > { %945 = vmatpush3.bf16.msra.mxu0 %v1049_v1  ;;  %s875_s13 = sshll.u32 %s1425_s10, 3  ;;  %957 = vmatpush3.bf16.msra.mxu1 %v1053_v3  ;;  %v1056_v10 = vld [vmem:[%s1408_s3 + $0x18] sm:$0xff]   ;;  %v1058_v12 = vld [vmem:[%s1408_s3 + $0x28] sm:$0xff]   ;;  %v1059_v13 = vld [vmem:[%s1408_s3 + $0x30] sm:$0xff]  }
  0x47   : > { %946 = vmatprep.subr.bf16.mxu0 %v1157_v0  ;;  %s353_s25 = scalar_lea.vmem %s1405_s0, %s875_s13  ;;  %958 = vmatprep.subr.bf16.mxu1 %v1157_v0  ;;  %v1060_v14 = vld [vmem:[%s1408_s3 + $0x38] sm:$0xff]   ;;  %v1061_v15 = vld [vmem:[#allocation4] sm:$0xff]   ;;  %v1062_v16 = vld [vmem:[#allocation4 + $0x8] sm:$0xff]   ;;  %s357_s11 = scalar_lea.vmem %s1414_s9, %s875_s13 }
  0x48   : > { %v359_v7 = vld [vmem:[%s353_s25] sm:$0xff]  ;;  %v1063_v17 = vld [vmem:[#allocation4 + $0x10] sm:$0xff]   ;;  %v1064_v18 = vld [vmem:[#allocation4 + $0x18] sm:$0xff]  }
  0x49   : > { %v360_v9 = vpack.c.bf16 %v359_v7, %v359_v7  ;;  %v1065_v19 = vld [vmem:[#allocation4 + $0x20] sm:$0xff]   ;;  %v1066_v20 = vld [vmem:[#allocation4 + $0x28] sm:$0xff]   ;;  %v1067_v29 = vld [vmem:[#allocation4 + $0x30] sm:$0xff]  }
  0x4a   : > { %947 = vmatpush3.bf16.msra.mxu0 %v1050_v2  ;;  %959 = vmatpush3.bf16.msra.mxu1 %v1054_v5  ;;  %v877_v21 = vld [vmem:[%s1407_s2] ss:$0 sm:$0xff]  ;;  %v1068_v30 = vld [vmem:[#allocation4 + $0x38] sm:$0xff]   ;;  %v1070_v32 = vld [vmem:[%s1412_s7 + $0x8] sm:$0xff]  }
  0x4b   : > { %948 = vmatprep.subr.bf16.mxu0 %v1157_v0  ;;  %960 = vmatprep.subr.bf16.mxu1 %v1157_v0  ;;  %v1069_v31 = vld [vmem:[%s1412_s7] sm:$0xff]   ;;  %v1071_v33 = vld [vmem:[%s1412_s7 + $0x10] sm:$0xff]   ;;  %v1072_v34 = vld [vmem:[%s1412_s7 + $0x18] sm:$0xff]  }
  0x4c   : > { %v1073_v35 = vld [vmem:[%s1412_s7 + $0x20] sm:$0xff]   ;;  %v1074_v36 = vld [vmem:[%s1412_s7 + $0x28] sm:$0xff]   ;;  %v1075_v45 = vld [vmem:[%s1412_s7 + $0x30] sm:$0xff]  }
  0x4d   : > { %v883_v37 = vld [vmem:[%s1409_s4] ss:$0 sm:$0xff]  ;;  %v1076_v46 = vld [vmem:[%s1412_s7 + $0x38] sm:$0xff]  }
  0x4e   : > { %949 = vmatpush3.bf16.msra.mxu0 %v1051_v4  ;;  %961 = vmatpush3.bf16.msra.mxu1 %v1055_v8  ;;  %v892_v47 = vld [vmem:[%s1411_s6] ss:$0 sm:$0xff] }
  0x4f   : > { %950 = vmatprep.subr.bf16.mxu0 %v1157_v0  ;;  %962 = vmatprep.subr.bf16.mxu1 %v1157_v0  ;;  %v901_v55 = vld [vmem:[%s1413_s8] ss:$0 sm:$0xff] }
  0x52   : > { %951 = vmatpush3.bf16.msra.mxu0 %v1052_v6  ;;  %963 = vmatpush3.bf16.msra.mxu1 %v1056_v10 }
  0x53   : > { %976 = vmatprep.subr.bf16.mxu0 %v1157_v0  ;;  %964 = vmatprep.subr.bf16.mxu1 %v1157_v0 }
  0x55   : > { %953 = vmatmul.mubr.msk.bf16.vlgmr.msra.gmra.mrb[0].mxu0 %vm400_vm1, %v360_v9 }
  0x56   : > { %992 = vmatprep.mubr.msk.bf16.mxu0 %vm1158_vm0, %v1157_v0  ;;  %965 = vmatpush3.bf16.msra.mxu1 %v1057_v11 }
  0x57   : > { %966 = vmatprep.subr.bf16.mxu1 %v1157_v0  ;;  %977 = vmatpush3.bf16.msra.mxu0 %v1061_v15 }
  0x58   : > { %978 = vmatprep.subr.bf16.mxu0 %v1157_v0 }
  0x5a   : > { %967 = vmatpush3.bf16.msra.mxu1 %v1058_v12 }
  0x5b   : > { %968 = vmatprep.subr.bf16.mxu1 %v1157_v0  ;;  %979 = vmatpush3.bf16.msra.mxu0 %v1062_v16 }
  0x5c   : > { %980 = vmatprep.subr.bf16.mxu0 %v1157_v0 }
  0x5e   : > { %969 = vmatpush3.bf16.msra.mxu1 %v1059_v13 }
  0x5f   : > { %970 = vmatprep.subr.bf16.mxu1 %v1157_v0  ;;  %981 = vmatpush3.bf16.msra.mxu0 %v1063_v17 }
  0x60   : > { %982 = vmatprep.subr.bf16.mxu0 %v1157_v0 }
  0x62   : > { %971 = vmatpush3.bf16.msra.mxu1 %v1060_v14 }
  0x63   : > { %996 = vmatprep.subr.bf16.mxu1 %v1157_v0  ;;  %983 = vmatpush3.bf16.msra.mxu0 %v1064_v18 }
  0x64   : > { %984 = vmatprep.subr.bf16.mxu0 %v1157_v0 }
  0x67   : > { %985 = vmatpush3.bf16.msra.mxu0 %v1065_v19 }
  0x68   : > { %986 = vmatprep.subr.bf16.mxu0 %v1157_v0 }
  0x6b   : > { %987 = vmatpush3.bf16.msra.mxu0 %v1066_v20 }
  0x6c   : > { %988 = vmatprep.subr.bf16.mxu0 %v1157_v0 }
  0x6f   : > { %989 = vmatpush3.bf16.msra.mxu0 %v1067_v29 }
  0x70   : > { %990 = vmatprep.subr.bf16.mxu0 %v1157_v0 }
  0x73   : > { %991 = vmatpush3.bf16.msra.mxu0 %v1068_v30 }
 0x128   : > { %v438_v22 = vpop.f32.mrb[0].mxu0 }
 0x129   : > { %v439_v23 = vadd.f32 %v877_v21, %v438_v22  ;;  %v954_v24 = vpop.f32.mrb[1].mxu0 }
 0x12a   : > { %v441_v25 = vpop.f32.mrb[2].mxu0 }
 0x12b   : > { %v444_v26 = vmax.f32 %v439_v23, 0.0  ;;  %v955_v27 = vpop.f32.mrb[3].mxu0 }
 0x12d   : > { %v445_v28 = vpack.c.bf16 %v444_v26, %v444_v26 }
 0x12f   : > { %973 = vmatmul.mubr.bf16.vlgmr.msra.gmra.mrb[0].mxu1 %v445_v28 }
 0x130   : > { %1012 = vmatprep.mubr.msk.bf16.mxu1 %vm1158_vm0, %v1157_v0  ;;  %997 = vmatpush3.bf16.msra.mxu1 %v1069_v31 }
 0x131   : > { %998 = vmatprep.subr.bf16.mxu1 %v1157_v0 }
 0x134   : > { %999 = vmatpush3.bf16.msra.mxu1 %v1070_v32 }
 0x135   : > { %1000 = vmatprep.subr.bf16.mxu1 %v1157_v0 }
 0x138   : > { %1001 = vmatpush3.bf16.msra.mxu1 %v1071_v33 }
 0x139   : > { %1002 = vmatprep.subr.bf16.mxu1 %v1157_v0 }
 0x13c   : > { %1003 = vmatpush3.bf16.msra.mxu1 %v1072_v34 }
 0x13d   : > { %1004 = vmatprep.subr.bf16.mxu1 %v1157_v0 }
 0x140   : > { %1005 = vmatpush3.bf16.msra.mxu1 %v1073_v35 }
 0x141   : > { %1006 = vmatprep.subr.bf16.mxu1 %v1157_v0 }
 0x144   : > { %1007 = vmatpush3.bf16.msra.mxu1 %v1074_v36 }
 0x145   : > { %1008 = vmatprep.subr.bf16.mxu1 %v1157_v0 }
 0x148   : > { %1009 = vmatpush3.bf16.msra.mxu1 %v1075_v45 }
 0x149   : > { %1010 = vmatprep.subr.bf16.mxu1 %v1157_v0 }
 0x14c   : > { %1011 = vmatpush3.bf16.msra.mxu1 %v1076_v46 }
 0x202   : > { %v551_v38 = vpop.f32.mrb[0].mxu1 }
 0x203   : > { %v552_v39 = vadd.f32 %v883_v37, %v551_v38  ;;  %v974_v40 = vpop.f32.mrb[1].mxu1 }
 0x204   : > { %v554_v41 = vpop.f32.mrb[2].mxu1 }
 0x205   : > { %v557_v42 = vmax.f32 %v552_v39, 0.0  ;;  %v975_v43 = vpop.f32.mrb[3].mxu1 }
 0x207   : > { %v558_v44 = vpack.c.bf16 %v557_v42, %v557_v42 }
 0x209   : > { %993 = vmatmul.mubr.bf16.vlgmr.msra.gmra.mrb[4].mxu0 %v558_v44 }
 0x2dc   : > { %v664_v48 = vpop.f32.mrb[4].mxu0 }
 0x2dd   : > { %v665_v49 = vadd.f32 %v892_v47, %v664_v48  ;;  %v994_v50 = vpop.f32.mrb[5].mxu0 }
 0x2de   : > { %v667_v51 = vpop.f32.mrb[6].mxu0 }
 0x2df   : > { %v670_v52 = vmax.f32 %v665_v49, 0.0  ;;  %v995_v53 = vpop.f32.mrb[7].mxu0 }
 0x2e1   : > { %v671_v54 = vpack.c.bf16 %v670_v52, %v670_v52 }
 0x2e3   : > { %1013 = vmatmul.mubr.bf16.vlgmr.msra.gmra.mrb[4].mxu1 %v671_v54 }
 0x3b6   : > { %v777_v56 = vpop.f32.mrb[4].mxu1 }
 0x3b7   : > { %v778_v57 = vadd.f32 %v901_v55, %v777_v56  ;;  %v1014_v58 = vpop.f32.mrb[5].mxu1 }
 0x3b8   : > { %v780_v59 = vpop.f32.mrb[6].mxu1 }
 0x3b9   : > { %v783_v60 = vsub.f32 0.0, %v778_v57  ;;  %v1015_v61 = vpop.f32.mrb[7].mxu1 }
 0x3bb   : > { %v784_v62 = vmul.f32 1.442695, %v783_v60 }
 0x3bd   : > { %1077 = vpow2.f32 %v784_v62 }
 0x3c7   : > { %v1078_v63 = vpop.eup %1077 }
 0x3c8   : > { %v786_v0 = vadd.f32 1.0, %v1078_v63 }
 0x3ca   : > { %1079 = vrcp.f32 %v786_v0 }
 0x3d4   : > { %v1080_v1 = vpop.eup %1079 }
 0x3d5   : > { %790 = vst.msk [vmem:[%s357_s11] sm:$0xff] %vm789_vm2, %v1080_v1 }
 0x3d6 PF: > { %s21_s30 = sadd.s32 1, %s1151_s30  }
 0x3d7   : > { %p18_p9 = scmp.ge.s32.totalorder %s21_s30, 4  }
 0x3d9   :  { %20 = sbr.rel (!%p18_p9) target bundleno = 2 (0x2), region = 95 }
 0x3e0   :  { %810 = vsyncpa [#allocation3], 1 }
 0x3e1   :  { %812 = vsyncpa [#allocation3 + $0x1], 1 }
 0x3e2   :  { %813 = vsyncpa [#allocation5], 1 }

</bundles_post_ra>
